<compile_context>
chip_gen: v5e
topology: v5e:2x2
jax: 0.10.0
libtpu: 0.0.40
codegen_flags: <defaults>
</compile_context>

<pallas_src>
import jax
import jax.numpy as jnp
from jax.experimental import pallas as pl
from jax.experimental.pallas import tpu as pltpu

_LANE = 128
_SUBLANE = 8


def _conv1x1_kernel(x_ref, w_ref, b_ref, o_ref):
    # x_ref: (NB, C_in, tL)   activations for NB batch rows / one L tile.
    # w_ref: (tCo, C_in)      weight tile (resident when the head is small).
    # b_ref: (tCo, 1)         bias tile.
    # o_ref: (NB, tCo, tL)    output tile, lane-dense along L.
    w = w_ref[...]
    b = b_ref[...].astype(jnp.float32)
    for i in range(x_ref.shape[0]):  # static unroll, NB <= 16
        acc = jnp.dot(w, x_ref[i], preferred_element_type=jnp.float32)
        o_ref[i] = (acc + b).astype(o_ref.dtype)


def _physical_vmem_bytes():
    """Per-core VMEM capacity (v5e/v6e: 128 MiB, v7x: 64 MiB)."""
    try:
        info = pltpu.get_tpu_info()
        cap = getattr(info, "vmem_capacity_bytes", None)
        if cap:
            return int(cap)
    except Exception:
        pass
    return 64 * 1024 * 1024  # conservative fallback (v7x per-core VMEM)


def _choose_tiles(N, C_in, C_out, L, x_item, w_item, budget):
    """Pick (NB, tL, tCo) so per-step DMA payload is big and VMEM fits."""
    # --- C_out tiling: keep the whole head resident unless it threatens VMEM.
    def w_foot(t):  # double-buffered weight + bias tiles
        return 2 * (t * C_in * w_item + t * w_item)

    if w_foot(C_out) <= budget // 4:
        t_co = C_out
    else:
        t_co = (budget // 4) // max(1, 2 * C_in * w_item)
        t_co = max(_SUBLANE, (t_co // _SUBLANE) * _SUBLANE)
        t_co = min(t_co, C_out)

    if L < _LANE:
        # Tiny sequence: full L per step; amortize the ~0.35 us per-grid-step
        # overhead by blocking NB batch rows, but keep >=2 grid steps (v7x).
        tl = L
        target_nb = max(1, (2 << 20) // max(1, C_in * L * x_item))
        per_b = 2 * (C_in + t_co) * L * x_item + t_co * L * 4  # dbl-buf x/out + f32 acc
        nb_vmem = max(1, (budget - w_foot(t_co)) // max(1, per_b))
        nb = int(max(1, min(16, target_nb, nb_vmem, max(1, N // 2))))
    else:
        nb = 1
        max_tl = max(_LANE, (L // _LANE) * _LANE)
        # Target a ~4 MiB x payload per grid step (HBM-bandwidth-bound op).
        tl = ((4 << 20) // max(1, C_in * x_item)) // _LANE * _LANE
        tl = int(max(_LANE, min(tl, max_tl)))

        def need(t):  # double-buffered x + out, resident W/b, f32 acc
            return 2 * (C_in + t_co) * t * x_item + t_co * t * 4 + w_foot(t_co)

        while tl > _LANE and need(tl) > budget:
            tl -= _LANE
        # v7x megacore: make sure the parallel grid has at least 2 steps.
        if N * pl.cdiv(L, tl) * pl.cdiv(C_out, t_co) < 2:
            tl = max(_LANE, ((L // 2) // _LANE) * _LANE)
    return nb, tl, t_co


def conv1x1_forward(z_prime, weight, bias):
    """1x1 Conv1d forward, matches nn.Conv1d(hidden_size, num_classes, 1).

    Args:
      z_prime: (N, C_in, L)      -- PyTorch NCW layout.
      weight:  (C_out, C_in, 1)  -- PyTorch Conv1d weight layout.
      bias:    (C_out,)
    Returns:
      (N, C_out, L)
    """
    N, C_in, L = z_prime.shape
    C_out = weight.shape[0]
    assert weight.shape == (C_out, C_in, 1)
    assert bias.shape == (C_out,)

    x_item = jnp.dtype(z_prime.dtype).itemsize
    w_item = jnp.dtype(weight.dtype).itemsize

    phys = _physical_vmem_bytes()
    budget = int(phys * 0.55)      # working-set budget used for tile sizing
    vmem_limit = int(phys * 0.75)  # raise scoped limit above 16/32 MiB defaults

    nb, tl, t_co = _choose_tiles(N, C_in, C_out, L, x_item, w_item, budget)

    # Glue (plain JAX, tiny): drop kernel-size-1 dim, shape bias for lane bcast.
    w = weight[:, :, 0]            # (C_out, C_in)
    b = bias.reshape(C_out, 1)     # (C_out, 1)

    grid = (pl.cdiv(N, nb), pl.cdiv(L, tl), pl.cdiv(C_out, t_co))

    out = pl.pallas_call(
        _conv1x1_kernel,
        out_shape=jax.ShapeDtypeStruct((N, C_out, L), z_prime.dtype),
        grid_spec=pltpu.PrefetchScalarGridSpec(
            num_scalar_prefetch=0,
            grid=grid,
            in_specs=[
                # Activations: NB batch rows x full C_in x one L tile.
                pl.BlockSpec((nb, C_in, tl), lambda n, l, co: (n, 0, l)),
                # Weight / bias tiles: constant index map when the head is
                # small -> stay resident in VMEM across the whole grid.
                pl.BlockSpec((t_co, C_in), lambda n, l, co: (co, 0)),
                pl.BlockSpec((t_co, 1), lambda n, l, co: (co, 0)),
            ],
            out_specs=pl.BlockSpec((nb, t_co, tl), lambda n, l, co: (n, co, l)),
        ),
        compiler_params=pltpu.CompilerParams(
            # All grid axes are independent -> shard across TCs on v7x.
            dimension_semantics=("parallel", "parallel", "parallel"),
            vmem_limit_bytes=int(vmem_limit),
        ),
    )(z_prime, w, b)

    return out


if __name__ == "__main__":
    key = jax.random.PRNGKey(0)
    k_x, k_w, k_b, k_x2 = jax.random.split(key, 4)

    # Shapes implied by the module: z_prime is (batch, hidden_size, seq).
    batch, hidden, seq, num_classes = 2, 32, 16, 8

    bound = 1.0 / (hidden ** 0.5)  # mimics PyTorch Conv1d uniform init range
    weight = jax.random.uniform(k_w, (num_classes, hidden, 1),
                                minval=-bound, maxval=bound, dtype=jnp.float32)
    bias = jax.random.uniform(k_b, (num_classes,),
                              minval=-bound, maxval=bound, dtype=jnp.float32)

    # --- Case 1: tiny sequence (small-L / batched-NB path) ---
    z1 = jax.random.normal(k_x, (batch, hidden, seq), dtype=jnp.float32)
    out1 = jax.block_until_ready(conv1x1_forward(z1, weight, bias))
    ref1 = jnp.einsum("ncl,oc->nol", z1, weight[:, :, 0]) + bias[None, :, None]
    assert out1.shape == (batch, num_classes, seq)
    assert jnp.allclose(out1, ref1, atol=1e-5, rtol=1e-5)

    # --- Case 2: longer sequence (lane-dense L tiles + masked ragged tail) ---
    seq2 = 704  # not a multiple of 128 -> exercises the tail block
    z2 = jax.random.normal(k_x2, (batch, hidden, seq2), dtype=jnp.float32)
    out2 = jax.block_until_ready(conv1x1_forward(z2, weight, bias))
    ref2 = jnp.einsum("ncl,oc->nol", z2, weight[:, :, 0]) + bias[None, :, None]
    assert out2.shape == (batch, num_classes, seq2)
    assert jnp.allclose(out2, ref2, atol=1e-5, rtol=1e-5)

    print("KERNEL_OK")
</pallas_src>

<mosaic_0001>
module attributes {stable_mosaic.version = 11 : i64} {
  func.func @_conv1x1_kernel(%arg0: i32, %arg1: i32, %arg2: i32, %arg3: memref<1x32x16xf32, #tpu.memory_space<vmem>>, %arg4: memref<8x32xf32, #tpu.memory_space<vmem>>, %arg5: memref<8x1xf32, #tpu.memory_space<vmem>>, %arg6: memref<1x8x16xf32, #tpu.memory_space<vmem>>) attributes {dimension_semantics = [#tpu.dimension_semantics<parallel>, #tpu.dimension_semantics<parallel>, #tpu.dimension_semantics<parallel>], iteration_bounds = array<i64: 2, 1, 1>, scalar_prefetch = 0 : i64, scratch_operands = 0 : i64, tpu.core_type = #tpu.core_type<tc>, window_params = [{transform_indices = @transform_0, window_bounds = array<i64: 1, 32, 16>}, {transform_indices = @transform_1, window_bounds = array<i64: 8, 32>}, {transform_indices = @transform_2, window_bounds = array<i64: 8, 1>}, {transform_indices = @transform_3, window_bounds = array<i64: 1, 8, 16>}]} {
    %c0 = arith.constant 0 : index
    %c0_0 = arith.constant 0 : index
    %0 = vector.load %arg4[%c0, %c0_0] : memref<8x32xf32, #tpu.memory_space<vmem>>, vector<8x32xf32>
    %c0_1 = arith.constant 0 : index
    %c0_2 = arith.constant 0 : index
    %1 = vector.load %arg5[%c0_1, %c0_2] : memref<8x1xf32, #tpu.memory_space<vmem>>, vector<8x1xf32>
    %c0_3 = arith.constant 0 : index
    %c0_4 = arith.constant 0 : index
    %c0_5 = arith.constant 0 : index
    %2 = vector.load %arg3[%c0_3, %c0_4, %c0_5] : memref<1x32x16xf32, #tpu.memory_space<vmem>>, vector<1x32x16xf32>
    %3 = vector.shape_cast %2 : vector<1x32x16xf32> to vector<32x16xf32>
    %cst = arith.constant dense<0.000000e+00> : vector<8x16xf32>
    %4 = tpu.matmul %0, %3, %cst {dimension_numbers = #tpu.dot_dimension_numbers<[1], [0], [0], [1], [0, 0, 1, 1], [], []>} : vector<8x32xf32>, vector<32x16xf32>, vector<8x16xf32> -> vector<8x16xf32>
    %5 = vector.broadcast %1 : vector<8x1xf32> to vector<8x16xf32>
    %6 = arith.addf %4, %5 : vector<8x16xf32>
    %c0_6 = arith.constant 0 : index
    %c0_7 = arith.constant 0 : index
    %c0_8 = arith.constant 0 : index
    %7 = vector.load %arg6[%c0_6, %c0_7, %c0_8] : memref<1x8x16xf32, #tpu.memory_space<vmem>>, vector<1x8x16xf32>
    %8 = vector.shape_cast %7 : vector<1x8x16xf32> to vector<8x16xf32>
    %9 = vector.shape_cast %6 : vector<8x16xf32> to vector<1x8x16xf32>
    tpu.vector_store %arg6[%c0_6, %c0_7, %c0_8], %9 {strides = array<i32>} : memref<1x8x16xf32, #tpu.memory_space<vmem>>, vector<1x8x16xf32>,
    return
  }
  func.func @transform_0(%arg0: i32, %arg1: i32, %arg2: i32) -> (i32, i32, i32) {
    %c0_i32 = arith.constant 0 : i32
    %c0_i32_0 = arith.constant 0 : i32
    return %arg0, %c0_i32, %arg1 : i32, i32, i32
  }
  func.func @transform_1(%arg0: i32, %arg1: i32, %arg2: i32) -> (i32, i32) {
    %c0_i32 = arith.constant 0 : i32
    %c0_i32_0 = arith.constant 0 : i32
    return %arg2, %c0_i32 : i32, i32
  }
  func.func @transform_2(%arg0: i32, %arg1: i32, %arg2: i32) -> (i32, i32) {
    %c0_i32 = arith.constant 0 : i32
    %c0_i32_0 = arith.constant 0 : i32
    return %arg2, %c0_i32 : i32, i32
  }
  func.func @transform_3(%arg0: i32, %arg1: i32, %arg2: i32) -> (i32, i32, i32) {
    %c0_i32 = arith.constant 0 : i32
    return %arg0, %arg2, %arg1 : i32, i32, i32
  }
}

</mosaic_0001>

<bundles_post_ra>
// kernel: tpu_custom_call.1
= control target key start
LH: loop header
LB: loop body
LE: loop exit
PB: predicated region body
PF: predicated region fallthrough
CT: control target
= control target key end

     0   :  { %8 = vsyncpa [#allocation3], 0  ;;  %s677_s0 = inlined_call_operand.vmem [shape: f32[2,32,16], index: 0, kind: input, shape index: {}]   ;;  %s678_s1 = inlined_call_operand.vmem [shape: f32[8,32], index: 1, kind: input, shape index: {}]   ;;  %s679_s2 = inlined_call_operand.vmem [shape: f32[8,1], index: 2, kind: input, shape index: {}]   ;;  %s680_s3 = inlined_call_operand.hbm [shape: f32[2,8,16], index: 3, kind: output, shape index: {}]  }
   0x1   :  { %10 = vsyncpa [#allocation3 + $0x1], 0  ;;  %s574_s12 = smov 0   ;;  %s576_s13 = smov 0  }
   0x2   :  { %s578_s14 = smov 0   ;;  %s580_s15 = smov 0  }
   0x3   :  { %s582_s16 = smov 0   ;;  %s584_s17 = smov 0  }
   0x4 LB: > { %s400_s18 = sadd.s32 4294967295, %s551_s17   ;;  %s401_s19 = sadd.s32 4294967294, %s551_s17   ;;  %s551_s17 = sphi %s584_s17, %s16_s17   ;;  %s547_s16 = sphi %s582_s16, %s687_s16   ;;  %s543_s15 = sphi %s580_s15, %s686_s15   ;;  %s539_s14 = sphi %s578_s14, %s685_s14   ;;  %s535_s13 = sphi %s576_s13, %s684_s13   ;;  %s531_s12 = sphi %s574_s12, %s683_s12  }
   0x5   : > { %s35_s20 = sadd.s32 1, %s547_s16  ;;  %s126_s21 = sadd.s32 1, %s539_s14 }
   0x6   : > { %p37_p0 = scmp.ge.s32.totalorder %s35_s20, 2  ;;  %p136_p1 = scmp.ne.s32.totalorder %s539_s14, %s535_s13 }
   0x7   : > { %p137_p2 = scmp.eq.s32.totalorder %s400_s18, 1  ;;  %p142_p3 = scmp.ne.s32.totalorder %s535_s13, %s531_s12 }
   0x8   : > { %s689_s20 = smov (%p37_p0, %s35_s20), 0  ;;  %p143_p5 = scmp.eq.s32.totalorder %s401_s19, 1 }
   0x9   : > { %p614_p4 = por %p137_p2, %p136_p1  ;;  %s119_s23 = ssub.s32 %s547_s16, %s689_s20 }
   0xa   : > { %p406_p6 = scmp.ge.s32.totalorder %s551_s17, 1  ;;  %p124_p7 = scmp.eq.s32.totalorder %s119_s23, 0 }
   0xb   : > { %p621_p8 = por %p143_p5, %p142_p3  ;;  %p186_p9 = scmp.lt.s32.totalorder %s551_s17, 3 }
   0xc   : > { %s627_s25 = scalar_select %p124_p7, %s539_s14, %s126_s21  }
   0xd   : > { %p187_p10 = pnand %p406_p6, %p186_p9 }
   0xe   : > { %p221_p11 = scmp.lt.s32.totalorder (!%p187_p10), %s543_s15, 1  ;;  %s218_s8 = sand.u32 (!%p187_p10), 1, %s535_s13  }
   0xf   : > { %190 = sbr.rel (%p187_p10) target bundleno = 163 (0xa3), region = 32  ;;  %s407_s9 = sshll.u32 (!%p187_p10), %s218_s8, 3 }
  0x10   : > { %s412_s10 = sshll.u32 (!%p187_p10), %s543_s15, 3  ;;  %s220_s21 = scalar_lea.vmem (!%p187_p10), [#allocation2], %s407_s9 }
  0x11   : > { %s287_s19 = scalar_lea.hbm (!%p187_p10), %s680_s3, %s412_s10  ;;  %s289_s23 = sshll.u32 (!%p187_p10), %s220_s21, 4  ;;  %s290_s23 = int_to_ptr.vmem [resolvable:$true] %s289_s23 }
  0x12   : > { %s291_s26 = sshll.u32 (!%p187_p10), %s287_s19, 4  ;;  %s275_s27 = scalar_lea.sflag (!%p187_p10), [#allocation3], %s218_s8  ;;  %s292_s26 = int_to_ptr.hbm [resolvable:$true] %s291_s26 }
  0x13   : > { %s493_s4 = scalar_lea.hbm (!%p187_p10), %s680_s3, 16 }
  0x14   : > { %v238_v0 = vld [vmem:[%s679_s2] sm:$0xff]  ;;  %v553_v1 = vmov 0   ;;  %s222_s28 = scalar_select %p221_p11, %s543_s15, 1  ;;  %vm248_vm0 = vcmask 261120   ;;  %vm272_vm1 = vcmask 130048  }
  0x15   : > { %472 = vset.pattern.permute.xlu0 %v553_v1  ;;  %v237_v6 = vld [vmem:[%s678_s1] sm:$0xff] }
  0x16   : > { %245 = vperm.xlu0 %472, %v238_v0   ;;  %s415_s29 = sshll.u32 %s222_s28, 5  ;;  %s487_s28 = sshra.s32 %s292_s26, 4  ;;  %s488_s28 = int_to_ptr.hbm [resolvable:$true] %s487_s28 }
  0x17   : > { %s228_s5 = scalar_lea.vmem %s677_s0, %s415_s29  ;;  %s489_s29 = scalar_lea.hbm %s488_s28, 8 }
  0x18   : > { %v242_v2 = vld [vmem:[%s228_s5 + $0x18] sm:$0xff]  ;;  %v241_v3 = vld [vmem:[%s228_s5 + $0x10] sm:$0xff]  ;;  %v240_v4 = vld [vmem:[%s228_s5 + $0x8] sm:$0xff]  ;;  %p490_p12 = scmp.ne.s32.totalorder %s488_s28, %s489_s29  ;;  %p494_p1 = scmp.lt.s32.totalorder %s488_s28, %s680_s3 }
  0x19   : > { %264 = vmatpush.msra.mxu0 %v242_v2  ;;  %v239_v5 = vld [vmem:[%s228_s5] sm:$0xff]  ;;  %p495_p2 = scmp.lt.s32.totalorder %s493_s4, %s489_s29 }
  0x1a   : > { %p491_p13 = pnand %p490_p12, %p614_p4 }
  0x1b   : > { %265 = vmatpush.msra.mxu0 %v241_v3  ;;  %p496_p3 = por %p495_p2, %p494_p1 }
  0x1c   : > { %p492_p0 = pneg %p491_p13 }
  0x1d   : > { %266 = vmatpush.msra.mxu0 %v240_v4 }
  0x1e   : > { %p497_p5 = pnand %p496_p3, %p492_p0 }
  0x1f   : > { %267 = vmatpush.msra.mxu0 %v239_v5 }
  0x20   : > { %410 = vmatmul.msk.f32.vlgmr.msra.gmra.mxu0 %vm248_vm0, %v237_v6 }
  0x88   : > { %v246_v7 = vpop.permute.xlu0 %245 }
  0x9d   : > { %v269_v8 = vpop.f32.mrf.mxu0 }
  0x9e   : > { %v270_v9 = vadd.f32 %v269_v8, %v246_v7 }
  0xa0   : > { %273 = vst.msk [vmem:[%s220_s21] sm:$0xff] %vm272_vm1, %v270_v9 }
  0xa1   : > { %500 = shalt.err (!%p497_p5)
}
  0xa2   : > { %416 = dma.vmem_to_hbm [thread:$0]  (%p614_p4), %s290_s23, 128, %s292_s26, %s275_s27  }
  0xa3 PF: > { %p422_p6 = scmp.ge.s32.totalorder %s551_s17, 2  ;;  %s303_s7 = sand.u32 1, %s531_s12  }
  0xa4   : > { %s304_s8 = scalar_lea.sflag [#allocation3], %s303_s7 }
  0xa5   : > { %p419_p7 = pnand %p422_p6, %p621_p8 }
  0xa7   : > { %p420_p9 = pneg %p419_p7 }
  0xa9   : > { %526 = dma.done.wait (%p420_p9), %s304_s8, 128  }
  0xaa   : > { %528 = vsyncadd (%p420_p9), %s304_s8, 4294967168  ;;  %s16_s17 = sadd.s32 1, %s551_s17   ;;  %s683_s12 = smov %s535_s13 }
  0xab   : > { %p13_p10 = scmp.ge.s32.totalorder %s16_s17, 4   ;;  %s684_s13 = smov %s539_s14 }
  0xac   : > { %s685_s14 = smov %s627_s25  ;;  %s686_s15 = smov %s547_s16 }
  0xad   : > { %s687_s16 = smov %s689_s20  ;;  %15 = sbr.rel (!%p13_p10) target bundleno = 4 (0x4), region = 73 }
  0xb2   :  { %310 = vsyncpa [#allocation3], 1 }
  0xb3   :  { %312 = vsyncpa [#allocation3 + $0x1], 1 }

</bundles_post_ra>
